<compile_context>
chip_gen: v5e
topology: v5e:2x2
jax: 0.10.0
libtpu: 0.0.40
codegen_flags: <defaults>
</compile_context>

<pallas_src>
import math
import functools

import jax
import jax.numpy as jnp
from jax.experimental import pallas as pl
from jax.experimental.pallas import tpu as pltpu

# ----------------------------- configuration --------------------------------
MODEL_DIMS = 32      # E
NUM_HEADS = 4        # H
HEAD_DIM = MODEL_DIMS // NUM_HEADS
L = 8                # target (query) sequence length
S = 16               # memory (key/value) sequence length
N = 2                # batch size
LN_EPS = 1e-5        # torch.nn.LayerNorm default eps


# ------------------------------- kernel --------------------------------------
def _cross_attn_kernel(tgt_ref, qpos_ref, mem_ref, pos_ref,
                       wq_ref, wk_ref, wv_ref, wo_ref,
                       bq_ref, bk_ref, bv_ref, bo_ref,
                       gamma_ref, beta_ref, out_ref,
                       *, num_heads, batch, q_len, kv_len):
    # Batch-major flattened activations: (N*L, E) queries, (N*S, E) memory.
    res = tgt_ref[...]                       # residual branch      (N*L, E)
    qi = res + qpos_ref[...]                 # query input = tgt + query_pos
    ki = mem_ref[...] + pos_ref[...]         # key   input = memory + pos
    vi = mem_ref[...]                        # value input = memory

    # Flattened QKV projections (weights pre-transposed host-side;
    # 1/sqrt(head_dim) already folded into wq/bq).
    q = jnp.dot(qi, wq_ref[...], preferred_element_type=jnp.float32) + bq_ref[...]
    k = jnp.dot(ki, wk_ref[...], preferred_element_type=jnp.float32) + bk_ref[...]
    v = jnp.dot(vi, wv_ref[...], preferred_element_type=jnp.float32) + bv_ref[...]

    e = q.shape[-1]
    d = e // num_heads
    wo = wo_ref[...]                         # (E, E), loaded once

    # Per-head attention, batched over the batch dim with 3-D einsums.
    # The output projection is accumulated per head, avoiding a lane
    # concatenate of the per-head contexts.
    attn_out = jnp.zeros((batch * q_len, e), jnp.float32)
    for h in range(num_heads):
        lo = h * d
        qh = q[:, lo:lo + d].reshape(batch, q_len, d)      # (N, L, D)
        kh = k[:, lo:lo + d].reshape(batch, kv_len, d)     # (N, S, D)
        vh = v[:, lo:lo + d].reshape(batch, kv_len, d)     # (N, S, D)
        s = jnp.einsum('bqd,bkd->bqk', qh, kh,
                       preferred_element_type=jnp.float32)  # (N, L, S)
        s = s - jnp.max(s, axis=-1, keepdims=True)
        p = jnp.exp(s)
        p = p * pl.reciprocal(jnp.sum(p, axis=-1, keepdims=True), approx=False)
        ctx = jnp.einsum('bqk,bkd->bqd', p, vh,
                         preferred_element_type=jnp.float32)  # (N, L, D)
        attn_out = attn_out + jnp.dot(
            ctx.reshape(batch * q_len, d), wo[lo:lo + d, :],
            preferred_element_type=jnp.float32)

    # Residual (dropout p=0.0 is identity) + LayerNorm over the feature axis.
    x = res + attn_out + bo_ref[...]
    mean = jnp.mean(x, axis=-1, keepdims=True)
    xc = x - mean
    var = jnp.mean(xc * xc, axis=-1, keepdims=True)
    y = xc * jax.lax.rsqrt(var + LN_EPS)
    y = y * gamma_ref[...] + beta_ref[...]
    out_ref[...] = y.astype(out_ref.dtype)


# --------------------------- parameter preparation ---------------------------
def prepare_params(in_proj_w, in_proj_b, out_proj_w, out_proj_b, gamma, beta,
                   num_heads=NUM_HEADS):
    """Torch-style MultiheadAttention / LayerNorm params -> kernel params.

    Weights are pre-transposed (x @ W^T == x @ w_t) and the 1/sqrt(head_dim)
    attention scale is folded into the Q projection (weight and bias) once,
    on the host.
    """
    e = out_proj_w.shape[0]
    d = e // num_heads
    scale = 1.0 / math.sqrt(d)
    return dict(
        wq_t=in_proj_w[0:e].T * scale,
        wk_t=in_proj_w[e:2 * e].T,
        wv_t=in_proj_w[2 * e:3 * e].T,
        wo_t=out_proj_w.T,
        bq=in_proj_b[0:e].reshape(1, e) * scale,
        bk=in_proj_b[e:2 * e].reshape(1, e),
        bv=in_proj_b[2 * e:3 * e].reshape(1, e),
        bo=out_proj_b.reshape(1, e),
        gamma=gamma.reshape(1, e),
        beta=beta.reshape(1, e),
    )


# ------------------------------- wrapper --------------------------------------
def cross_attention_layer(params, tgt, memory, pos=None, query_pos=None):
    """Forward of CrossAttentionLayer (eval mode, no masks).

    tgt:       (L, N, E)   memory: (S, N, E)
    pos:       (S, N, E)   query_pos: (L, N, E)
    returns:   (L, N, E)
    """
    l, n, e = tgt.shape
    s = memory.shape[0]

    def to_batch_major(x):
        # (T, N, E) -> (N*T, E); single cheap transpose+flatten per input.
        t = x.shape[0]
        return jnp.transpose(x, (1, 0, 2)).reshape(n * t, e)

    tgt_bm = to_batch_major(tgt)
    qpos_bm = (to_batch_major(query_pos) if query_pos is not None
               else jnp.zeros_like(tgt_bm))
    mem_bm = to_batch_major(memory)
    pos_bm = (to_batch_major(pos) if pos is not None
              else jnp.zeros_like(mem_bm))

    kernel = functools.partial(_cross_attn_kernel, num_heads=NUM_HEADS,
                               batch=n, q_len=l, kv_len=s)

    act_q = pl.BlockSpec((n * l, e), lambda i: (0, 0))
    act_kv = pl.BlockSpec((n * s, e), lambda i: (0, 0))
    mat = pl.BlockSpec((e, e), lambda i: (0, 0))
    vec = pl.BlockSpec((1, e), lambda i: (0, 0))

    out_bm = pl.pallas_call(
        kernel,
        out_shape=jax.ShapeDtypeStruct((n * l, e), tgt.dtype),
        grid=(1,),   # single fused step: all batches in one kernel invocation
        in_specs=[act_q, act_q, act_kv, act_kv,
                  mat, mat, mat, mat,
                  vec, vec, vec, vec, vec, vec],
        out_specs=act_q,
        compiler_params=pltpu.CompilerParams(dimension_semantics=("arbitrary",)),
    )(tgt_bm, qpos_bm, mem_bm, pos_bm,
      params["wq_t"], params["wk_t"], params["wv_t"], params["wo_t"],
      params["bq"], params["bk"], params["bv"], params["bo"],
      params["gamma"], params["beta"])

    # back to sequence-first (L, N, E)
    return jnp.transpose(out_bm.reshape(n, l, e), (1, 0, 2))


# --------------------------- pure-JAX reference -------------------------------
def reference(raw, tgt, memory, pos=None, query_pos=None):
    e = MODEL_DIMS
    h, d = NUM_HEADS, MODEL_DIMS // NUM_HEADS
    wq = raw["in_proj_w"][0:e]
    wk = raw["in_proj_w"][e:2 * e]
    wv = raw["in_proj_w"][2 * e:3 * e]
    bq = raw["in_proj_b"][0:e]
    bk = raw["in_proj_b"][e:2 * e]
    bv = raw["in_proj_b"][2 * e:3 * e]

    q_in = tgt if query_pos is None else tgt + query_pos
    k_in = memory if pos is None else memory + pos
    qb = jnp.transpose(q_in, (1, 0, 2)) @ wq.T + bq
    kb = jnp.transpose(k_in, (1, 0, 2)) @ wk.T + bk
    vb = jnp.transpose(memory, (1, 0, 2)) @ wv.T + bv
    n, l, _ = qb.shape
    s = kb.shape[1]
    qh = qb.reshape(n, l, h, d).transpose(0, 2, 1, 3) * (1.0 / math.sqrt(d))
    kh = kb.reshape(n, s, h, d).transpose(0, 2, 1, 3)
    vh = vb.reshape(n, s, h, d).transpose(0, 2, 1, 3)
    p = jax.nn.softmax(qh @ jnp.swapaxes(kh, -1, -2), axis=-1)
    ctx = (p @ vh).transpose(0, 2, 1, 3).reshape(n, l, e)
    attn_out = ctx @ raw["out_proj_w"].T + raw["out_proj_b"]
    x = jnp.transpose(tgt, (1, 0, 2)) + attn_out
    mean = x.mean(-1, keepdims=True)
    var = ((x - mean) ** 2).mean(-1, keepdims=True)
    y = (x - mean) / jnp.sqrt(var + LN_EPS) * raw["gamma"] + raw["beta"]
    return jnp.transpose(y, (1, 0, 2))


# ---------------------------------- main --------------------------------------
if __name__ == "__main__":
    key = jax.random.PRNGKey(0)
    kw1, kw2, kt, km, kp, kq = jax.random.split(key, 6)

    def xavier_uniform(k, shape):
        fan_out, fan_in = shape  # torch Linear-style (out_features, in_features)
        a = math.sqrt(6.0 / (fan_in + fan_out))
        return jax.random.uniform(k, shape, jnp.float32, -a, a)

    E = MODEL_DIMS
    # nn.MultiheadAttention params, matching _reset_parameters():
    # xavier_uniform on weights (dim>1), biases stay zero; LayerNorm is (1, 0).
    raw = dict(
        in_proj_w=xavier_uniform(kw1, (3 * E, E)),      # in_proj_weight (3E, E)
        in_proj_b=jnp.zeros((3 * E,), jnp.float32),
        out_proj_w=xavier_uniform(kw2, (E, E)),         # out_proj.weight (E, E)
        out_proj_b=jnp.zeros((E,), jnp.float32),
        gamma=jnp.ones((E,), jnp.float32),
        beta=jnp.zeros((E,), jnp.float32),
    )
    params = prepare_params(raw["in_proj_w"], raw["in_proj_b"],
                            raw["out_proj_w"], raw["out_proj_b"],
                            raw["gamma"], raw["beta"])

    tgt = jax.random.normal(kt, (L, N, E), jnp.float32)
    memory = jax.random.normal(km, (S, N, E), jnp.float32)
    pos = jax.random.normal(kp, (S, N, E), jnp.float32)
    query_pos = jax.random.normal(kq, (L, N, E), jnp.float32)

    out = cross_attention_layer(params, tgt, memory, pos=pos, query_pos=query_pos)
    out = jax.block_until_ready(out)

    ref = reference(raw, tgt, memory, pos=pos, query_pos=query_pos)
    assert out.shape == (L, N, E)
    max_err = float(jnp.max(jnp.abs(out - ref)))
    assert jnp.allclose(out, ref, atol=1e-4, rtol=1e-4), max_err
    print("KERNEL_OK")
</pallas_src>

<mosaic_0001>
module attributes {stable_mosaic.version = 11 : i64} {
  func.func @_cross_attn_kernel(%arg0: i32, %arg1: memref<16x32xf32, #tpu.memory_space<vmem>>, %arg2: memref<16x32xf32, #tpu.memory_space<vmem>>, %arg3: memref<32x32xf32, #tpu.memory_space<vmem>>, %arg4: memref<32x32xf32, #tpu.memory_space<vmem>>, %arg5: memref<32x32xf32, #tpu.memory_space<vmem>>, %arg6: memref<32x32xf32, #tpu.memory_space<vmem>>, %arg7: memref<32x32xf32, #tpu.memory_space<vmem>>, %arg8: memref<32x32xf32, #tpu.memory_space<vmem>>, %arg9: memref<1x32xf32, #tpu.memory_space<vmem>>, %arg10: memref<1x32xf32, #tpu.memory_space<vmem>>, %arg11: memref<1x32xf32, #tpu.memory_space<vmem>>, %arg12: memref<1x32xf32, #tpu.memory_space<vmem>>, %arg13: memref<1x32xf32, #tpu.memory_space<vmem>>, %arg14: memref<1x32xf32, #tpu.memory_space<vmem>>, %arg15: memref<16x32xf32, #tpu.memory_space<vmem>>) attributes {dimension_semantics = [#tpu.dimension_semantics<arbitrary>], iteration_bounds = array<i64: 1>, scalar_prefetch = 0 : i64, scratch_operands = 0 : i64, tpu.core_type = #tpu.core_type<tc>, window_params = [{pipeline_mode = #tpu.pipeline_mode<synchronous>, transform_indices = @transform_0, window_bounds = array<i64: 16, 32>}, {pipeline_mode = #tpu.pipeline_mode<synchronous>, transform_indices = @transform_1, window_bounds = array<i64: 16, 32>}, {pipeline_mode = #tpu.pipeline_mode<synchronous>, transform_indices = @transform_2, window_bounds = array<i64: 32, 32>}, {pipeline_mode = #tpu.pipeline_mode<synchronous>, transform_indices = @transform_3, window_bounds = array<i64: 32, 32>}, {pipeline_mode = #tpu.pipeline_mode<synchronous>, transform_indices = @transform_4, window_bounds = array<i64: 32, 32>}, {pipeline_mode = #tpu.pipeline_mode<synchronous>, transform_indices = @transform_5, window_bounds = array<i64: 32, 32>}, {pipeline_mode = #tpu.pipeline_mode<synchronous>, transform_indices = @transform_6, window_bounds = array<i64: 32, 32>}, {pipeline_mode = #tpu.pipeline_mode<synchronous>, transform_indices = @transform_7, window_bounds = array<i64: 32, 32>}, {pipeline_mode = #tpu.pipeline_mode<synchronous>, transform_indices = @transform_8, window_bounds = array<i64: 1, 32>}, {pipeline_mode = #tpu.pipeline_mode<synchronous>, transform_indices = @transform_9, window_bounds = array<i64: 1, 32>}, {pipeline_mode = #tpu.pipeline_mode<synchronous>, transform_indices = @transform_10, window_bounds = array<i64: 1, 32>}, {pipeline_mode = #tpu.pipeline_mode<synchronous>, transform_indices = @transform_11, window_bounds = array<i64: 1, 32>}, {pipeline_mode = #tpu.pipeline_mode<synchronous>, transform_indices = @transform_12, window_bounds = array<i64: 1, 32>}, {pipeline_mode = #tpu.pipeline_mode<synchronous>, transform_indices = @transform_13, window_bounds = array<i64: 1, 32>}, {pipeline_mode = #tpu.pipeline_mode<synchronous>, transform_indices = @transform_14, window_bounds = array<i64: 16, 32>}]} {
    %c0 = arith.constant 0 : index
    %c0_0 = arith.constant 0 : index
    %0 = vector.load %arg1[%c0, %c0_0] : memref<16x32xf32, #tpu.memory_space<vmem>>, vector<16x32xf32>
    %c0_1 = arith.constant 0 : index
    %c0_2 = arith.constant 0 : index
    %1 = vector.load %arg2[%c0_1, %c0_2] : memref<16x32xf32, #tpu.memory_space<vmem>>, vector<16x32xf32>
    %2 = arith.addf %0, %1 : vector<16x32xf32>
    %c0_3 = arith.constant 0 : index
    %c0_4 = arith.constant 0 : index
    %3 = vector.load %arg3[%c0_3, %c0_4] : memref<32x32xf32, #tpu.memory_space<vmem>>, vector<32x32xf32>
    %c0_5 = arith.constant 0 : index
    %c0_6 = arith.constant 0 : index
    %4 = vector.load %arg4[%c0_5, %c0_6] : memref<32x32xf32, #tpu.memory_space<vmem>>, vector<32x32xf32>
    %5 = arith.addf %3, %4 : vector<32x32xf32>
    %c0_7 = arith.constant 0 : index
    %c0_8 = arith.constant 0 : index
    %6 = vector.load %arg3[%c0_7, %c0_8] : memref<32x32xf32, #tpu.memory_space<vmem>>, vector<32x32xf32>
    %c0_9 = arith.constant 0 : index
    %c0_10 = arith.constant 0 : index
    %7 = vector.load %arg5[%c0_9, %c0_10] : memref<32x32xf32, #tpu.memory_space<vmem>>, vector<32x32xf32>
    %cst = arith.constant dense<0.000000e+00> : vector<16x32xf32>
    %8 = tpu.matmul %2, %7, %cst {dimension_numbers = #tpu.dot_dimension_numbers<[1], [0], [0], [1], [0, 0, 1, 1], [], []>} : vector<16x32xf32>, vector<32x32xf32>, vector<16x32xf32> -> vector<16x32xf32>
    %c0_11 = arith.constant 0 : index
    %c0_12 = arith.constant 0 : index
    %9 = vector.load %arg9[%c0_11, %c0_12] : memref<1x32xf32, #tpu.memory_space<vmem>>, vector<1x32xf32>
    %10 = vector.broadcast %9 : vector<1x32xf32> to vector<16x32xf32>
    %11 = arith.addf %8, %10 : vector<16x32xf32>
    %c0_13 = arith.constant 0 : index
    %c0_14 = arith.constant 0 : index
    %12 = vector.load %arg6[%c0_13, %c0_14] : memref<32x32xf32, #tpu.memory_space<vmem>>, vector<32x32xf32>
    %cst_15 = arith.constant dense<0.000000e+00> : vector<32x32xf32>
    %13 = tpu.matmul %5, %12, %cst_15 {dimension_numbers = #tpu.dot_dimension_numbers<[1], [0], [0], [1], [0, 0, 1, 1], [], []>} : vector<32x32xf32>, vector<32x32xf32>, vector<32x32xf32> -> vector<32x32xf32>
    %c0_16 = arith.constant 0 : index
    %c0_17 = arith.constant 0 : index
    %14 = vector.load %arg10[%c0_16, %c0_17] : memref<1x32xf32, #tpu.memory_space<vmem>>, vector<1x32xf32>
    %15 = vector.broadcast %14 : vector<1x32xf32> to vector<32x32xf32>
    %16 = arith.addf %13, %15 : vector<32x32xf32>
    %c0_18 = arith.constant 0 : index
    %c0_19 = arith.constant 0 : index
    %17 = vector.load %arg7[%c0_18, %c0_19] : memref<32x32xf32, #tpu.memory_space<vmem>>, vector<32x32xf32>
    %cst_20 = arith.constant dense<0.000000e+00> : vector<32x32xf32>
    %18 = tpu.matmul %6, %17, %cst_20 {dimension_numbers = #tpu.dot_dimension_numbers<[1], [0], [0], [1], [0, 0, 1, 1], [], []>} : vector<32x32xf32>, vector<32x32xf32>, vector<32x32xf32> -> vector<32x32xf32>
    %c0_21 = arith.constant 0 : index
    %c0_22 = arith.constant 0 : index
    %19 = vector.load %arg11[%c0_21, %c0_22] : memref<1x32xf32, #tpu.memory_space<vmem>>, vector<1x32xf32>
    %20 = vector.broadcast %19 : vector<1x32xf32> to vector<32x32xf32>
    %21 = arith.addf %18, %20 : vector<32x32xf32>
    %c0_23 = arith.constant 0 : index
    %c0_24 = arith.constant 0 : index
    %22 = vector.load %arg8[%c0_23, %c0_24] : memref<32x32xf32, #tpu.memory_space<vmem>>, vector<32x32xf32>
    %cst_25 = arith.constant 0.000000e+00 : f32
    %23 = vector.broadcast %cst_25 : f32 to vector<16x32xf32>
    %24 = vector.extract_strided_slice %11 {offsets = [0, 0], sizes = [16, 8], strides = [1, 1]} : vector<16x32xf32> to vector<16x8xf32>
    %25 = vector.shape_cast %24 : vector<16x8xf32> to vector<2x8x8xf32>
    %26 = vector.extract_strided_slice %16 {offsets = [0, 0], sizes = [32, 8], strides = [1, 1]} : vector<32x32xf32> to vector<32x8xf32>
    %27 = vector.shape_cast %26 : vector<32x8xf32> to vector<2x16x8xf32>
    %28 = vector.extract_strided_slice %21 {offsets = [0, 0], sizes = [32, 8], strides = [1, 1]} : vector<32x32xf32> to vector<32x8xf32>
    %29 = vector.shape_cast %28 : vector<32x8xf32> to vector<2x16x8xf32>
    "tpu.trace_start"() <{level = 10 : i32, message = "bqd,bkd->bqk"}> : () -> ()
    %cst_26 = arith.constant dense<0.000000e+00> : vector<2x8x16xf32>
    %30 = tpu.matmul %25, %27, %cst_26 {dimension_numbers = #tpu.dot_dimension_numbers<[2], [2], [1], [1], [0, 0, 0, 1, 1, 1], [0], [0]>} : vector<2x8x8xf32>, vector<2x16x8xf32>, vector<2x8x16xf32> -> vector<2x8x16xf32>
    "tpu.trace_stop"() : () -> ()
    %cst_27 = arith.constant dense<0xFF800000> : vector<2x8xf32>
    %31 = vector.multi_reduction <maximumf>, %30, %cst_27 [2] : vector<2x8x16xf32> to vector<2x8xf32>
    %32 = vector.shape_cast %31 : vector<2x8xf32> to vector<2x8x1xf32>
    %33 = vector.broadcast %32 : vector<2x8x1xf32> to vector<2x8x16xf32>
    %34 = arith.subf %30, %33 : vector<2x8x16xf32>
    %35 = math.exp %34 : vector<2x8x16xf32>
    %cst_28 = arith.constant dense<0.000000e+00> : vector<2x8xf32>
    %36 = vector.multi_reduction <add>, %35, %cst_28 [2] : vector<2x8x16xf32> to vector<2x8xf32>
    %37 = vector.shape_cast %36 : vector<2x8xf32> to vector<2x8x1xf32>
    %38 = tpu.reciprocal %37 : vector<2x8x1xf32> -> vector<2x8x1xf32>
    %39 = vector.broadcast %38 : vector<2x8x1xf32> to vector<2x8x16xf32>
    %40 = arith.mulf %35, %39 : vector<2x8x16xf32>
    "tpu.trace_start"() <{level = 10 : i32, message = "bqk,bkd->bqd"}> : () -> ()
    %cst_29 = arith.constant dense<0.000000e+00> : vector<2x8x8xf32>
    %41 = tpu.matmul %40, %29, %cst_29 {dimension_numbers = #tpu.dot_dimension_numbers<[2], [1], [1], [2], [0, 0, 0, 1, 1, 2], [0], [0]>} : vector<2x8x16xf32>, vector<2x16x8xf32>, vector<2x8x8xf32> -> vector<2x8x8xf32>
    "tpu.trace_stop"() : () -> ()
    %42 = vector.shape_cast %41 : vector<2x8x8xf32> to vector<16x8xf32>
    %43 = vector.extract_strided_slice %22 {offsets = [0, 0], sizes = [8, 32], strides = [1, 1]} : vector<32x32xf32> to vector<8x32xf32>
    %cst_30 = arith.constant dense<0.000000e+00> : vector<16x32xf32>
    %44 = tpu.matmul %42, %43, %cst_30 {dimension_numbers = #tpu.dot_dimension_numbers<[1], [0], [0], [1], [0, 0, 1, 1], [], []>} : vector<16x8xf32>, vector<8x32xf32>, vector<16x32xf32> -> vector<16x32xf32>
    %45 = arith.addf %23, %44 : vector<16x32xf32>
    %46 = vector.extract_strided_slice %11 {offsets = [0, 8], sizes = [16, 8], strides = [1, 1]} : vector<16x32xf32> to vector<16x8xf32>
    %47 = vector.shape_cast %46 : vector<16x8xf32> to vector<2x8x8xf32>
    %48 = vector.extract_strided_slice %16 {offsets = [0, 8], sizes = [32, 8], strides = [1, 1]} : vector<32x32xf32> to vector<32x8xf32>
    %49 = vector.shape_cast %48 : vector<32x8xf32> to vector<2x16x8xf32>
    %50 = vector.extract_strided_slice %21 {offsets = [0, 8], sizes = [32, 8], strides = [1, 1]} : vector<32x32xf32> to vector<32x8xf32>
    %51 = vector.shape_cast %50 : vector<32x8xf32> to vector<2x16x8xf32>
    "tpu.trace_start"() <{level = 10 : i32, message = "bqd,bkd->bqk"}> : () -> ()
    %cst_31 = arith.constant dense<0.000000e+00> : vector<2x8x16xf32>
    %52 = tpu.matmul %47, %49, %cst_31 {dimension_numbers = #tpu.dot_dimension_numbers<[2], [2], [1], [1], [0, 0, 0, 1, 1, 1], [0], [0]>} : vector<2x8x8xf32>, vector<2x16x8xf32>, vector<2x8x16xf32> -> vector<2x8x16xf32>
    "tpu.trace_stop"() : () -> ()
    %cst_32 = arith.constant dense<0xFF800000> : vector<2x8xf32>
    %53 = vector.multi_reduction <maximumf>, %52, %cst_32 [2] : vector<2x8x16xf32> to vector<2x8xf32>
    %54 = vector.shape_cast %53 : vector<2x8xf32> to vector<2x8x1xf32>
    %55 = vector.broadcast %54 : vector<2x8x1xf32> to vector<2x8x16xf32>
    %56 = arith.subf %52, %55 : vector<2x8x16xf32>
    %57 = math.exp %56 : vector<2x8x16xf32>
    %cst_33 = arith.constant dense<0.000000e+00> : vector<2x8xf32>
    %58 = vector.multi_reduction <add>, %57, %cst_33 [2] : vector<2x8x16xf32> to vector<2x8xf32>
    %59 = vector.shape_cast %58 : vector<2x8xf32> to vector<2x8x1xf32>
    %60 = tpu.reciprocal %59 : vector<2x8x1xf32> -> vector<2x8x1xf32>
    %61 = vector.broadcast %60 : vector<2x8x1xf32> to vector<2x8x16xf32>
    %62 = arith.mulf %57, %61 : vector<2x8x16xf32>
    "tpu.trace_start"() <{level = 10 : i32, message = "bqk,bkd->bqd"}> : () -> ()
    %cst_34 = arith.constant dense<0.000000e+00> : vector<2x8x8xf32>
    %63 = tpu.matmul %62, %51, %cst_34 {dimension_numbers = #tpu.dot_dimension_numbers<[2], [1], [1], [2], [0, 0, 0, 1, 1, 2], [0], [0]>} : vector<2x8x16xf32>, vector<2x16x8xf32>, vector<2x8x8xf32> -> vector<2x8x8xf32>
    "tpu.trace_stop"() : () -> ()
    %64 = vector.shape_cast %63 : vector<2x8x8xf32> to vector<16x8xf32>
    %65 = vector.extract_strided_slice %22 {offsets = [8, 0], sizes = [8, 32], strides = [1, 1]} : vector<32x32xf32> to vector<8x32xf32>
    %cst_35 = arith.constant dense<0.000000e+00> : vector<16x32xf32>
    %66 = tpu.matmul %64, %65, %cst_35 {dimension_numbers = #tpu.dot_dimension_numbers<[1], [0], [0], [1], [0, 0, 1, 1], [], []>} : vector<16x8xf32>, vector<8x32xf32>, vector<16x32xf32> -> vector<16x32xf32>
    %67 = arith.addf %45, %66 : vector<16x32xf32>
    %68 = vector.extract_strided_slice %11 {offsets = [0, 16], sizes = [16, 8], strides = [1, 1]} : vector<16x32xf32> to vector<16x8xf32>
    %69 = vector.shape_cast %68 : vector<16x8xf32> to vector<2x8x8xf32>
    %70 = vector.extract_strided_slice %16 {offsets = [0, 16], sizes = [32, 8], strides = [1, 1]} : vector<32x32xf32> to vector<32x8xf32>
    %71 = vector.shape_cast %70 : vector<32x8xf32> to vector<2x16x8xf32>
    %72 = vector.extract_strided_slice %21 {offsets = [0, 16], sizes = [32, 8], strides = [1, 1]} : vector<32x32xf32> to vector<32x8xf32>
    %73 = vector.shape_cast %72 : vector<32x8xf32> to vector<2x16x8xf32>
    "tpu.trace_start"() <{level = 10 : i32, message = "bqd,bkd->bqk"}> : () -> ()
    %cst_36 = arith.constant dense<0.000000e+00> : vector<2x8x16xf32>
    %74 = tpu.matmul %69, %71, %cst_36 {dimension_numbers = #tpu.dot_dimension_numbers<[2], [2], [1], [1], [0, 0, 0, 1, 1, 1], [0], [0]>} : vector<2x8x8xf32>, vector<2x16x8xf32>, vector<2x8x16xf32> -> vector<2x8x16xf32>
    "tpu.trace_stop"() : () -> ()
    %cst_37 = arith.constant dense<0xFF800000> : vector<2x8xf32>
    %75 = vector.multi_reduction <maximumf>, %74, %cst_37 [2] : vector<2x8x16xf32> to vector<2x8xf32>
    %76 = vector.shape_cast %75 : vector<2x8xf32> to vector<2x8x1xf32>
    %77 = vector.broadcast %76 : vector<2x8x1xf32> to vector<2x8x16xf32>
    %78 = arith.subf %74, %77 : vector<2x8x16xf32>
    %79 = math.exp %78 : vector<2x8x16xf32>
    %cst_38 = arith.constant dense<0.000000e+00> : vector<2x8xf32>
    %80 = vector.multi_reduction <add>, %79, %cst_38 [2] : vector<2x8x16xf32> to vector<2x8xf32>
    %81 = vector.shape_cast %80 : vector<2x8xf32> to vector<2x8x1xf32>
    %82 = tpu.reciprocal %81 : vector<2x8x1xf32> -> vector<2x8x1xf32>
    %83 = vector.broadcast %82 : vector<2x8x1xf32> to vector<2x8x16xf32>
    %84 = arith.mulf %79, %83 : vector<2x8x16xf32>
    "tpu.trace_start"() <{level = 10 : i32, message = "bqk,bkd->bqd"}> : () -> ()
    %cst_39 = arith.constant dense<0.000000e+00> : vector<2x8x8xf32>
    %85 = tpu.matmul %84, %73, %cst_39 {dimension_numbers = #tpu.dot_dimension_numbers<[2], [1], [1], [2], [0, 0, 0, 1, 1, 2], [0], [0]>} : vector<2x8x16xf32>, vector<2x16x8xf32>, vector<2x8x8xf32> -> vector<2x8x8xf32>
    "tpu.trace_stop"() : () -> ()
    %86 = vector.shape_cast %85 : vector<2x8x8xf32> to vector<16x8xf32>
    %87 = vector.extract_strided_slice %22 {offsets = [16, 0], sizes = [8, 32], strides = [1, 1]} : vector<32x32xf32> to vector<8x32xf32>
    %cst_40 = arith.constant dense<0.000000e+00> : vector<16x32xf32>
    %88 = tpu.matmul %86, %87, %cst_40 {dimension_numbers = #tpu.dot_dimension_numbers<[1], [0], [0], [1], [0, 0, 1, 1], [], []>} : vector<16x8xf32>, vector<8x32xf32>, vector<16x32xf32> -> vector<16x32xf32>
    %89 = arith.addf %67, %88 : vector<16x32xf32>
    %90 = vector.extract_strided_slice %11 {offsets = [0, 24], sizes = [16, 8], strides = [1, 1]} : vector<16x32xf32> to vector<16x8xf32>
    %91 = vector.shape_cast %90 : vector<16x8xf32> to vector<2x8x8xf32>
    %92 = vector.extract_strided_slice %16 {offsets = [0, 24], sizes = [32, 8], strides = [1, 1]} : vector<32x32xf32> to vector<32x8xf32>
    %93 = vector.shape_cast %92 : vector<32x8xf32> to vector<2x16x8xf32>
    %94 = vector.extract_strided_slice %21 {offsets = [0, 24], sizes = [32, 8], strides = [1, 1]} : vector<32x32xf32> to vector<32x8xf32>
    %95 = vector.shape_cast %94 : vector<32x8xf32> to vector<2x16x8xf32>
    "tpu.trace_start"() <{level = 10 : i32, message = "bqd,bkd->bqk"}> : () -> ()
    %cst_41 = arith.constant dense<0.000000e+00> : vector<2x8x16xf32>
    %96 = tpu.matmul %91, %93, %cst_41 {dimension_numbers = #tpu.dot_dimension_numbers<[2], [2], [1], [1], [0, 0, 0, 1, 1, 1], [0], [0]>} : vector<2x8x8xf32>, vector<2x16x8xf32>, vector<2x8x16xf32> -> vector<2x8x16xf32>
    "tpu.trace_stop"() : () -> ()
    %cst_42 = arith.constant dense<0xFF800000> : vector<2x8xf32>
    %97 = vector.multi_reduction <maximumf>, %96, %cst_42 [2] : vector<2x8x16xf32> to vector<2x8xf32>
    %98 = vector.shape_cast %97 : vector<2x8xf32> to vector<2x8x1xf32>
    %99 = vector.broadcast %98 : vector<2x8x1xf32> to vector<2x8x16xf32>
    %100 = arith.subf %96, %99 : vector<2x8x16xf32>
    %101 = math.exp %100 : vector<2x8x16xf32>
    %cst_43 = arith.constant dense<0.000000e+00> : vector<2x8xf32>
    %102 = vector.multi_reduction <add>, %101, %cst_43 [2] : vector<2x8x16xf32> to vector<2x8xf32>
    %103 = vector.shape_cast %102 : vector<2x8xf32> to vector<2x8x1xf32>
    %104 = tpu.reciprocal %103 : vector<2x8x1xf32> -> vector<2x8x1xf32>
    %105 = vector.broadcast %104 : vector<2x8x1xf32> to vector<2x8x16xf32>
    %106 = arith.mulf %101, %105 : vector<2x8x16xf32>
    "tpu.trace_start"() <{level = 10 : i32, message = "bqk,bkd->bqd"}> : () -> ()
    %cst_44 = arith.constant dense<0.000000e+00> : vector<2x8x8xf32>
    %107 = tpu.matmul %106, %95, %cst_44 {dimension_numbers = #tpu.dot_dimension_numbers<[2], [1], [1], [2], [0, 0, 0, 1, 1, 2], [0], [0]>} : vector<2x8x16xf32>, vector<2x16x8xf32>, vector<2x8x8xf32> -> vector<2x8x8xf32>
    "tpu.trace_stop"() : () -> ()
    %108 = vector.shape_cast %107 : vector<2x8x8xf32> to vector<16x8xf32>
    %109 = vector.extract_strided_slice %22 {offsets = [24, 0], sizes = [8, 32], strides = [1, 1]} : vector<32x32xf32> to vector<8x32xf32>
    %cst_45 = arith.constant dense<0.000000e+00> : vector<16x32xf32>
    %110 = tpu.matmul %108, %109, %cst_45 {dimension_numbers = #tpu.dot_dimension_numbers<[1], [0], [0], [1], [0, 0, 1, 1], [], []>} : vector<16x8xf32>, vector<8x32xf32>, vector<16x32xf32> -> vector<16x32xf32>
    %111 = arith.addf %89, %110 : vector<16x32xf32>
    %112 = arith.addf %0, %111 : vector<16x32xf32>
    %c0_46 = arith.constant 0 : index
    %c0_47 = arith.constant 0 : index
    %113 = vector.load %arg12[%c0_46, %c0_47] : memref<1x32xf32, #tpu.memory_space<vmem>>, vector<1x32xf32>
    %114 = vector.broadcast %113 : vector<1x32xf32> to vector<16x32xf32>
    %115 = arith.addf %112, %114 : vector<16x32xf32>
    %cst_48 = arith.constant dense<0.000000e+00> : vector<16xf32>
    %116 = vector.multi_reduction <add>, %115, %cst_48 [1] : vector<16x32xf32> to vector<16xf32>
    %117 = vector.shape_cast %116 : vector<16xf32> to vector<16x1xf32>
    %cst_49 = arith.constant 3.200000e+01 : f32
    %118 = vector.broadcast %cst_49 : f32 to vector<16x1xf32>
    %119 = arith.divf %117, %118 : vector<16x1xf32>
    %120 = vector.broadcast %119 : vector<16x1xf32> to vector<16x32xf32>
    %121 = arith.subf %115, %120 : vector<16x32xf32>
    %122 = arith.mulf %121, %121 : vector<16x32xf32>
    %cst_50 = arith.constant dense<0.000000e+00> : vector<16xf32>
    %123 = vector.multi_reduction <add>, %122, %cst_50 [1] : vector<16x32xf32> to vector<16xf32>
    %124 = vector.shape_cast %123 : vector<16xf32> to vector<16x1xf32>
    %cst_51 = arith.constant 3.200000e+01 : f32
    %125 = vector.broadcast %cst_51 : f32 to vector<16x1xf32>
    %126 = arith.divf %124, %125 : vector<16x1xf32>
    %cst_52 = arith.constant 9.99999974E-6 : f32
    %127 = vector.broadcast %cst_52 : f32 to vector<16x1xf32>
    %128 = arith.addf %126, %127 : vector<16x1xf32>
    %129 = math.rsqrt %128 : vector<16x1xf32>
    %130 = vector.broadcast %129 : vector<16x1xf32> to vector<16x32xf32>
    %131 = arith.mulf %121, %130 : vector<16x32xf32>
    %c0_53 = arith.constant 0 : index
    %c0_54 = arith.constant 0 : index
    %132 = vector.load %arg13[%c0_53, %c0_54] : memref<1x32xf32, #tpu.memory_space<vmem>>, vector<1x32xf32>
    %133 = vector.broadcast %132 : vector<1x32xf32> to vector<16x32xf32>
    %134 = arith.mulf %131, %133 : vector<16x32xf32>
    %c0_55 = arith.constant 0 : index
    %c0_56 = arith.constant 0 : index
    %135 = vector.load %arg14[%c0_55, %c0_56] : memref<1x32xf32, #tpu.memory_space<vmem>>, vector<1x32xf32>
    %136 = vector.broadcast %135 : vector<1x32xf32> to vector<16x32xf32>
    %137 = arith.addf %134, %136 : vector<16x32xf32>
    %c0_57 = arith.constant 0 : index
    %c0_58 = arith.constant 0 : index
    %138 = vector.load %arg15[%c0_57, %c0_58] : memref<16x32xf32, #tpu.memory_space<vmem>>, vector<16x32xf32>
    tpu.vector_store %arg15[%c0_57, %c0_58], %137 {strides = array<i32>} : memref<16x32xf32, #tpu.memory_space<vmem>>, vector<16x32xf32>,
    return
  }
  func.func @transform_0(%arg0: i32) -> (i32, i32) {
    %c0_i32 = arith.constant 0 : i32
    %c0_i32_0 = arith.constant 0 : i32
    %c0_i32_1 = arith.constant 0 : i32
    return %c0_i32, %c0_i32_0 : i32, i32
  }
  func.func @transform_1(%arg0: i32) -> (i32, i32) {
    %c0_i32 = arith.constant 0 : i32
    %c0_i32_0 = arith.constant 0 : i32
    %c0_i32_1 = arith.constant 0 : i32
    return %c0_i32, %c0_i32_0 : i32, i32
  }
  func.func @transform_2(%arg0: i32) -> (i32, i32) {
    %c0_i32 = arith.constant 0 : i32
    %c0_i32_0 = arith.constant 0 : i32
    %c0_i32_1 = arith.constant 0 : i32
    return %c0_i32, %c0_i32_0 : i32, i32
  }
  func.func @transform_3(%arg0: i32) -> (i32, i32) {
    %c0_i32 = arith.constant 0 : i32
    %c0_i32_0 = arith.constant 0 : i32
    %c0_i32_1 = arith.constant 0 : i32
    return %c0_i32, %c0_i32_0 : i32, i32
  }
  func.func @transform_4(%arg0: i32) -> (i32, i32) {
    %c0_i32 = arith.constant 0 : i32
    %c0_i32_0 = arith.constant 0 : i32
    %c0_i32_1 = arith.constant 0 : i32
    return %c0_i32, %c0_i32_0 : i32, i32
  }
  func.func @transform_5(%arg0: i32) -> (i32, i32) {
    %c0_i32 = arith.constant 0 : i32
    %c0_i32_0 = arith.constant 0 : i32
    %c0_i32_1 = arith.constant 0 : i32
    return %c0_i32, %c0_i32_0 : i32, i32
  }
  func.func @transform_6(%arg0: i32) -> (i32, i32) {
    %c0_i32 = arith.constant 0 : i32
    %c0_i32_0 = arith.constant 0 : i32
    %c0_i32_1 = arith.constant 0 : i32
    return %c0_i32, %c0_i32_0 : i32, i32
  }
  func.func @transform_7(%arg0: i32) -> (i32, i32) {
    %c0_i32 = arith.constant 0 : i32
    %c0_i32_0 = arith.constant 0 : i32
    %c0_i32_1 = arith.constant 0 : i32
    return %c0_i32, %c0_i32_0 : i32, i32
  }
  func.func @transform_8(%arg0: i32) -> (i32, i32) {
    %c0_i32 = arith.constant 0 : i32
    %c0_i32_0 = arith.constant 0 : i32
    %c0_i32_1 = arith.constant 0 : i32
    return %c0_i32, %c0_i32_0 : i32, i32
  }
  func.func @transform_9(%arg0: i32) -> (i32, i32) {
    %c0_i32 = arith.constant 0 : i32
    %c0_i32_0 = arith.constant 0 : i32
    %c0_i32_1 = arith.constant 0 : i32
    return %c0_i32, %c0_i32_0 : i32, i32
  }
  func.func @transform_10(%arg0: i32) -> (i32, i32) {
    %c0_i32 = arith.constant 0 : i32
    %c0_i32_0 = arith.constant 0 : i32
    %c0_i32_1 = arith.constant 0 : i32
    return %c0_i32, %c0_i32_0 : i32, i32
  }
  func.func @transform_11(%arg0: i32) -> (i32, i32) {
    %c0_i32 = arith.constant 0 : i32
    %c0_i32_0 = arith.constant 0 : i32
    %c0_i32_1 = arith.constant 0 : i32
    return %c0_i32, %c0_i32_0 : i32, i32
  }
  func.func @transform_12(%arg0: i32) -> (i32, i32) {
    %c0_i32 = arith.constant 0 : i32
    %c0_i32_0 = arith.constant 0 : i32
    %c0_i32_1 = arith.constant 0 : i32
    return %c0_i32, %c0_i32_0 : i32, i32
  }
  func.func @transform_13(%arg0: i32) -> (i32, i32) {
    %c0_i32 = arith.constant 0 : i32
    %c0_i32_0 = arith.constant 0 : i32
    %c0_i32_1 = arith.constant 0 : i32
    return %c0_i32, %c0_i32_0 : i32, i32
  }
  func.func @transform_14(%arg0: i32) -> (i32, i32) {
    %c0_i32 = arith.constant 0 : i32
    %c0_i32_0 = arith.constant 0 : i32
    %c0_i32_1 = arith.constant 0 : i32
    return %c0_i32, %c0_i32_0 : i32, i32
  }
}

</mosaic_0001>

<bundles_post_ra>
// kernel: tpu_custom_call.1
= control target key start
LH: loop header
LB: loop body
LE: loop exit
PB: predicated region body
PF: predicated region fallthrough
CT: control target
= control target key end

     0   :  { %19 = vsyncpa [#allocation3], 0  ;;  %s1916_s0 = inlined_call_operand.hbm [shape: f32[16,32], index: 0, kind: input, shape index: {}]   ;;  %s1917_s1 = inlined_call_operand.hbm [shape: f32[16,32], index: 1, kind: input, shape index: {}]   ;;  %s1918_s2 = inlined_call_operand.hbm [shape: f32[32,32], index: 2, kind: input, shape index: {}]   ;;  %s1919_s3 = inlined_call_operand.hbm [shape: f32[32,32], index: 3, kind: input, shape index: {}]   ;;  %s1920_s4 = inlined_call_operand.hbm [shape: f32[32,32], index: 4, kind: input, shape index: {}]   ;;  %s1921_s5 = inlined_call_operand.hbm [shape: f32[32,32], index: 5, kind: input, shape index: {}]   ;;  %s1922_s6 = inlined_call_operand.hbm [shape: f32[32,32], index: 6, kind: input, shape index: {}]   ;;  %s1923_s7 = inlined_call_operand.hbm [shape: f32[32,32], index: 7, kind: input, shape index: {}]   ;;  %s1924_s8 = inlined_call_operand.vmem [shape: f32[1,32], index: 8, kind: input, shape index: {}]   ;;  %s1925_s9 = inlined_call_operand.vmem [shape: f32[1,32], index: 9, kind: input, shape index: {}]   ;;  %s1926_s10 = inlined_call_operand.vmem [shape: f32[1,32], index: 10, kind: input, shape index: {}]   ;;  %s1927_s11 = inlined_call_operand.vmem [shape: f32[1,32], index: 11, kind: input, shape index: {}]   ;;  %s1928_s12 = inlined_call_operand.vmem [shape: f32[1,32], index: 12, kind: input, shape index: {}]   ;;  %s1929_s13 = inlined_call_operand.vmem [shape: f32[1,32], index: 13, kind: input, shape index: {}]   ;;  %s1930_s14 = inlined_call_operand.hbm [shape: f32[16,32], index: 14, kind: output, shape index: {}]  }
   0x1   :  { %20 = vsyncpa [#allocation6], 0 }
   0x2   :  { %21 = vsyncpa [#allocation9], 0 }
   0x3   :  { %22 = vsyncpa [#allocation12], 0 }
   0x4   :  { %23 = vsyncpa [#allocation15], 0 }
   0x5   :  { %24 = vsyncpa [#allocation4], 0  ;;  %s42_s15 = sshll.u32 %s1917_s1, 4  ;;  %s1586_s16 = smov [#allocation5]   ;;  %s43_s15 = int_to_ptr.hbm [resolvable:$true] %s42_s15 }
   0x6   :  { %s44_s17 = sshll.u32 %s1586_s16, 4  ;;  %s68_s20 = sshll.u32 %s1919_s3, 4  ;;  %s45_s17 = int_to_ptr.vmem [resolvable:$true] %s44_s17  ;;  %s69_s20 = int_to_ptr.hbm [resolvable:$true] %s68_s20 }
   0x7   :  { %s1587_s21 = smov 128   ;;  %s1588_s22 = smov 8  }
   0x8   :  { %50 = dma.hbm_to_vmem [thread:$0]  %s43_s15, 256, %s45_s17, [#allocation6], %s1587_s21, %s1587_s21, %s1588_s22  }
   0x9   :  { %s1589_s23 = smov [#allocation8]   ;;  %s94_s1 = sshll.u32 %s1921_s5, 4  ;;  %s95_s1 = int_to_ptr.hbm [resolvable:$true] %s94_s1 }
   0xa   :  { %s70_s24 = sshll.u32 %s1589_s23, 4  ;;  %s29_s28 = sshll.u32 %s1916_s0, 4  ;;  %s71_s24 = int_to_ptr.vmem [resolvable:$true] %s70_s24  ;;  %s30_s28 = int_to_ptr.hbm [resolvable:$true] %s29_s28 }
   0xb   :  { %76 = dma.hbm_to_vmem [thread:$0]  %s69_s20, 512, %s71_s24, [#allocation9], %s1587_s21, %s1587_s21, %s1588_s22  }
   0xc   :  { %s1590_s29 = smov [#allocation11]   ;;  %s1591_s15 = smov [#allocation2]  }
   0xd   :  { %s96_s30 = sshll.u32 %s1590_s29, 4  ;;  %s31_s5 = sshll.u32 %s1591_s15, 4  ;;  %s97_s30 = int_to_ptr.vmem [resolvable:$true] %s96_s30  ;;  %s32_s5 = int_to_ptr.vmem [resolvable:$true] %s31_s5 }
   0xe   :  { %102 = dma.hbm_to_vmem [thread:$0]  %s95_s1, 512, %s97_s30, [#allocation12], %s1587_s21, %s1587_s21, %s1588_s22  }
   0xf   :  { %s55_s18 = sshll.u32 %s1918_s2, 4  ;;  %s81_s20 = sshll.u32 %s1920_s4, 4  ;;  %s56_s18 = int_to_ptr.hbm [resolvable:$true] %s55_s18  ;;  %s82_s20 = int_to_ptr.hbm [resolvable:$true] %s81_s20 }
  0x10   :  { %37 = dma.hbm_to_vmem [thread:$0]  %s30_s28, 256, %s32_s5, [#allocation3], %s1587_s21, %s1587_s21, %s1588_s22  }
  0x11   :  { %s1592_s23 = smov [#allocation7]   ;;  %s1593_s25 = smov [#allocation10]  }
  0x12   :  { %s57_s24 = sshll.u32 %s1592_s23, 4  ;;  %s83_s2 = sshll.u32 %s1593_s25, 4  ;;  %s58_s24 = int_to_ptr.vmem [resolvable:$true] %s57_s24  ;;  %s84_s2 = int_to_ptr.vmem [resolvable:$true] %s83_s2 }
  0x13   :  { %63 = dma.hbm_to_vmem [thread:$0]  %s56_s18, 512, %s58_s24, [#allocation6], %s1587_s21, %s1587_s21, %s1588_s22  }
  0x14   :  { %s107_s3 = sshll.u32 %s1922_s6, 4  ;;  %s120_s28 = sshll.u32 %s1923_s7, 4  ;;  %s108_s3 = int_to_ptr.hbm [resolvable:$true] %s107_s3  ;;  %s121_s28 = int_to_ptr.hbm [resolvable:$true] %s120_s28 }
  0x15   :  { %89 = dma.hbm_to_vmem [thread:$0]  %s82_s20, 512, %s84_s2, [#allocation9], %s1587_s21, %s1587_s21, %s1588_s22  }
  0x16   :  { %s1594_s29 = smov [#allocation13]   ;;  %s1595_s15 = smov [#allocation14]  }
  0x17   :  { %s109_s30 = sshll.u32 %s1594_s29, 4  ;;  %s122_s6 = sshll.u32 %s1595_s15, 4  ;;  %s110_s30 = int_to_ptr.vmem [resolvable:$true] %s109_s30  ;;  %s123_s6 = int_to_ptr.vmem [resolvable:$true] %s122_s6 }
  0x18   :  { %115 = dma.hbm_to_vmem [thread:$0]  %s108_s3, 512, %s110_s30, [#allocation12], %s1587_s21, %s1587_s21, %s1588_s22  }
  0x19   :  { %128 = dma.hbm_to_vmem [thread:$0]  %s121_s28, 512, %s123_s6, [#allocation15], %s1587_s21, %s1587_s21, %s1588_s22  }
  0x1a   :  { %1574 = dma.done.wait [#allocation3], 256  }
  0x1b   :  { %1575 = vsyncadd [#allocation3], 4294967040 }
  0x1c   :  { %1576 = dma.done.wait [#allocation6], 768  }
  0x1d   :  { %1577 = vsyncadd [#allocation6], 4294966528 }
  0x1e   :  { %1578 = dma.done.wait [#allocation9], 1024  }
  0x1f   :  { %1579 = vsyncadd [#allocation9], 4294966272 }
  0x20   :  { %1580 = dma.done.wait [#allocation12], 1024  }
  0x21   :  { %1581 = vsyncadd [#allocation12], 4294966272 }
  0x22   :  { %1582 = dma.done.wait [#allocation15], 512  }
  0x23   :  { %1583 = vsyncadd [#allocation15], 4294966784  ;;  %v194_v0 = vld [vmem:[#allocation10 + $0x18] sm:$0xff]  ;;  %v193_v1 = vld [vmem:[#allocation10 + $0x10] sm:$0xff]  ;;  %vm199_vm0 = vcmask 261120   ;;  %s1596_s16 = smov 120  }
  0x24   :  { %1265 = vmatpush.msra.mxu1 %v194_v0  ;;  %v1724_v2 = vld [vmem:[#allocation2 + $0x8] sm:$0xff]  ;;  %v176_v3 = vld [vmem:[#allocation5 + $0x8] sm:$0xff]  ;;  %218 = vmatpush.msra.mxu0 %v194_v0  ;;  %v191_v5 = vld [vmem:[#allocation10] sm:$0xff]  ;;  %vm331_vm1 = vcmask 64512   ;;  %vm390_vm2 = vcmask 130048   ;;  %s1598_s0 = smov 104  }
  0x25   :  { %v192_v4 = vld [vmem:[#allocation10 + $0x8] sm:$0xff]  ;;  %v178_v6 = vadd.f32 %v176_v3, %v1724_v2  ;;  %v1727_v7 = vld [vmem:[#allocation2] sm:$0xff]  ;;  %v175_v8 = vld [vmem:[#allocation5] sm:$0xff]  ;;  %s1198_s1 = sshll.u32 %s1930_s14, 4  ;;  %s1199_s1 = int_to_ptr.hbm [resolvable:$true] %s1198_s1 }
  0x26   :  { %1266 = vmatpush.msra.mxu1 %v193_v1  ;;  %219 = vmatpush.msra.mxu0 %v193_v1  ;;  %v232_v9 = vld [vmem:[#allocation11 + $0x18] sm:$0xff]  ;;  %v177_v10 = vadd.f32 %v175_v8, %v1727_v7  ;;  %v231_v11 = vld [vmem:[#allocation11 + $0x10] sm:$0xff]  ;;  %v179_v14 = vld [vmem:[#allocation7] sm:$0xff] }
  0x27   :  { %v281_v12 = vld [vmem:[#allocation13 + $0x18] sm:$0xff]  ;;  %v280_v13 = vld [vmem:[#allocation13 + $0x10] sm:$0xff]  ;;  %v183_v15 = vld [vmem:[#allocation8] sm:$0xff] }
  0x28   :  { %1267 = vmatpush.msra.mxu1 %v192_v4  ;;  %220 = vmatpush.msra.mxu0 %v192_v4  ;;  %v230_v16 = vld [vmem:[#allocation11 + $0x8] sm:$0xff]  ;;  %v229_v18 = vld [vmem:[#allocation11] sm:$0xff]  ;;  %v187_v19 = vadd.f32 %v183_v15, %v179_v14  ;;  %v181_v24 = vld [vmem:[#allocation7 + $0x10] sm:$0xff] }
  0x29   :  { %310 = vmatpush.msra.mxu2 %v281_v12  ;;  %v279_v17 = vld [vmem:[#allocation13 + $0x8] sm:$0xff]  ;;  %v278_v20 = vld [vmem:[#allocation13] sm:$0xff]  ;;  %v185_v25 = vld [vmem:[#allocation8 + $0x10] sm:$0xff] }
  0x2a   :  { %1268 = vmatpush.msra.mxu1 %v191_v5  ;;  %221 = vmatpush.msra.mxu0 %v191_v5  ;;  %v180_v21 = vld [vmem:[#allocation7 + $0x8] sm:$0xff]  ;;  %v189_v26 = vadd.f32 %v185_v25, %v181_v24  ;;  %v182_v27 = vld [vmem:[#allocation7 + $0x18] sm:$0xff]  ;;  %v1314_v30 = vld [vmem:[%s1924_s8] ss:$0 sm:$0xff] }
  0x2b   :  { %1216 = vmatmul.msk.f32.vlgmr.msra.gmra.mxu1 %vm199_vm0, %v178_v6  ;;  %1215 = vmatmul.msk.f32.vlgmr.msra.gmra.mxu0 %vm199_vm0, %v177_v10  ;;  %v184_v22 = vld [vmem:[#allocation8 + $0x8] sm:$0xff]  ;;  %v186_v28 = vld [vmem:[#allocation8 + $0x18] sm:$0xff]  ;;  %v1315_v35 = vld [vmem:[%s1925_s9] ss:$0 sm:$0xff] }
  0x2c   :  { %261 = vmatpush.msrb.mxu1 %v232_v9  ;;  %311 = vmatpush.msra.mxu2 %v280_v13  ;;  %v188_v23 = vadd.f32 %v184_v22, %v180_v21  ;;  %v190_v29 = vadd.f32 %v186_v28, %v182_v27  ;;  %v1316_v45 = vld [vmem:[%s1926_s10] ss:$0 sm:$0xff]  ;;  %s1597_s10 = smov 112  }
  0x2e   :  { %262 = vmatpush.msrb.mxu1 %v231_v11  ;;  %312 = vmatpush.msra.mxu2 %v279_v17 }
  0x30   :  { %263 = vmatpush.msrb.mxu1 %v230_v16  ;;  %313 = vmatpush.msra.mxu2 %v278_v20 }
  0x31   :  { %1221 = vmatmul.msk.f32.vlgmr.msra.gmra.mxu2 %vm199_vm0, %v179_v14 }
  0x32   :  { %264 = vmatpush.msrb.mxu1 %v229_v18 }
  0x33   :  { %1217 = vmatmul.msk.f32.vlgmr.msrb.gmra.mxu1 %vm199_vm0, %v187_v19 }
  0x39   :  { %1222 = vmatmul.msk.f32.gmra.mxu2 %vm199_vm0, %v180_v21 }
  0x3b   :  { %1218 = vmatmul.msk.f32.gmra.mxu1 %vm199_vm0, %v188_v23 }
  0x41   :  { %1223 = vmatmul.msk.f32.gmra.mxu2 %vm199_vm0, %v181_v24 }
  0x43   :  { %1219 = vmatmul.msk.f32.gmra.mxu1 %vm199_vm0, %v189_v26 }
  0x49   :  { %1224 = vmatmul.msk.f32.gmra.mxu2 %vm199_vm0, %v182_v27 }
  0x4b   :  { %1220 = vmatmul.msk.f32.gmra.mxu1 %vm199_vm0, %v190_v29 }
  0xa8   :  { %v226_v31 = vpop.f32.mrf.mxu1  ;;  %v223_v32 = vpop.f32.mrf.mxu0 }
  0xa9   :  { %v1743_v33 = vadd.f32 %v1314_v30, %v223_v32  ;;  %v1772_v43 = vadd.f32 %v1314_v30, %v226_v31 }
  0xab   :  { %485 = vrot.lane.b32.xlu2 %v1743_v33, %s1596_s16 }
  0xb0   :  { %v266_v34 = vpop.f32.mrf.mxu1 }
  0xb1   :  { %v1756_v38 = vadd.f32 %v1315_v35, %v266_v34 }
  0xb4   :  { %v315_v44 = vpop.f32.mrf.mxu2 }
  0xb5   :  { %v316_v47 = vadd.f32 %v1316_v45, %v315_v44 }
  0xb8   :  { %v269_v36 = vpop.f32.mrf.mxu1 }
  0xb9   :  { %v1750_v37 = vadd.f32 %v1315_v35, %v269_v36 }
  0xbb   :  { %489 = vrot.lane.b32.xlu1 %v1750_v37, %s1596_s16  ;;  %1225 = vmatpush.xpose.msk.msra.mxu3 %vm331_vm1, %v1750_v37 }
  0xbc   :  { %v318_v46 = vpop.f32.mrf.mxu2 }
  0xbd   :  { %v319_v48 = vadd.f32 %v1316_v45, %v318_v46 }
  0xbf   :  { %1226 = vmatpush.xpose.msk.msra.mxu3 %vm331_vm1, %v1756_v38  ;;  %456 = vmatpush.msrb.mxu0 %v319_v48  ;;  %v1793_v3 = vpack.i.bf16 %v316_v47, %v319_v48 }
  0xc0   :  { %v272_v39 = vpop.f32.mrf.mxu1 }
  0xc1   :  { %v1766_v42 = vadd.f32 %v1315_v35, %v272_v39  ;;  %457 = vmatpush.msrb.mxu0 %v316_v47 }
  0xc2   :  { %1227 = vmatmul.msk.f32.vlgmr.msra.gmra.mxu3 %vm331_vm1, %v1743_v33 }
  0xc3   :  { %487 = vrot.lane.b32.xlu1 %v1756_v38, %s1596_s16 }
  0xc4   :  { %v321_v4 = vpop.f32.mrf.mxu2 }
  0xc5   :  { %v1799_v9 = vadd.f32 %v1316_v45, %v321_v4 }
  0xc8   :  { %v275_v40 = vpop.f32.mrf.mxu1 }
  0xc9   :  { %v1764_v41 = vadd.f32 %v1315_v35, %v275_v40 }
  0xcb   :  { %1228 = vmatpush.xpose.msk.msrb.mxu3 %vm331_vm1, %v1764_v41 }
  0xcc   :  { %v324_v5 = vpop.f32.mrf.mxu2 }
  0xcd   :  { %v1797_v8 = vadd.f32 %v1316_v45, %v324_v5  ;;  %v327_v45 = vld [vmem:[#allocation14] sm:$0xff] }
  0xcf   :  { %1229 = vmatpush.xpose.msk.msrb.mxu3 %vm331_vm1, %v1766_v42 }
  0xd2   :  { %1230 = vmatmul.msk.f32.vlgmr.msrb.gmra.mxu3 %vm331_vm1, %v1772_v43 }
  0xd3   :  { %479 = vmatpush.msra.mxu3 %v1797_v8 }
  0xd5   :  { %480 = vmatpush.msra.mxu3 %v1799_v9 }
 0x105   :  { %v486_v58 = vpop.permute.xlu2 %485 }
 0x12d   :  { %v490_v49 = vpop.permute.xlu1 %489 }
 0x12e   :  { %1233 = vmatpush.xpose.msk.msra.mxu0 %vm331_vm1, %v490_v49 }
 0x135   :  { %v488_v50 = vpop.permute.xlu1 %487 }
 0x136   :  { %1234 = vmatpush.xpose.msk.msra.mxu0 %vm331_vm1, %v488_v50 }
 0x145   :  { %v358_v51 = vpop.f32.mrf.mxu3 }
 0x146   :  { %v391_v52 = vsel %vm390_vm2, %v358_v51, -inf }
 0x147   :  { %392 = vmax.xlane.f32.xlu0 %v391_v52 }
 0x155   :  { %v387_v53 = vpop.f32.mrf.mxu3 }
 0x156   :  { %v394_v54 = vsel %vm390_vm2, %v387_v53, -inf }
 0x157   :  { %395 = vmax.xlane.f32.xlu2 %v394_v54 }
 0x16f   :  { %519 = vrot.lane.b32.xlu2 %v1766_v42, %s1596_s16 }
 0x177   :  { %717 = vrot.lane.b32.xlu2 %v1743_v33, %s1597_s10 }
 0x1ba   :  { %v393_v55 = vpop.xlane.xlu0 %392 }
 0x1bb   :  { %v397_v56 = vsub.f32 %v358_v51, %v393_v55 }
 0x1bd   :  { %v399_v57 = vmul.f32 1.442695, %v397_v56 }
 0x1bf   :  { %1320 = vpow2.f32 %v399_v57 }
 0x1c5   :  { %v1321_v59 = vpop.eup %1320 }
 0x1c6   :  { %v403_v60 = vsel %vm390_vm2, %v1321_v59, 0.0 }
 0x1c7   :  { %404 = vadd.xlane.f32.xlu0 %v403_v60 }
 0x1ca   :  { %v396_v61 = vpop.xlane.xlu2 %395 }
 0x1cb   :  { %v398_v62 = vsub.f32 %v387_v53, %v396_v61 }
 0x1cd   :  { %v401_v63 = vmul.f32 1.442695, %v398_v62 }
 0x1cf   :  { %1322 = vpow2.f32 %v401_v63 }
 0x1d2   :  { %v520_v24 = vpop.permute.xlu2 %519 }
 0x1d5   :  { %v1323_v0 = vpop.eup %1322 }
 0x1d6   :  { %v406_v1 = vsel %vm390_vm2, %v1323_v0, 0.0 }
 0x1d7   :  { %407 = vadd.xlane.f32.xlu1 %v406_v1 }
 0x1db   :  { %521 = vrot.lane.b32.xlu0 %v1764_v41, %s1596_s16 }
 0x1e3   :  { %517 = vrot.lane.b32.xlu0 %v1772_v43, %s1596_s16 }
 0x1f0   :  { %1285 = vrot.lane.b32.xlu1 %v1793_v3, %s1596_s16 }
 0x23a   :  { %v405_v6 = vpop.xlane.xlu0 %404 }
 0x23b   :  { %1324 = vrcp.f32 %v405_v6  ;;  %v420_v14 = vand.u32 2147483648, %v405_v6  ;;  %v418_v15 = vand.u32 2147483647, %v405_v6  ;;  %vm414_vm4 = vweird.f32 %v405_v6 }
 0x23d   :  { %v421_v17 = vor.u32 1.1754944e-38, %v420_v14  ;;  %vm419_vm6 = vcmp.eq.f32.partialorder %v418_v15, 8.507059e+37 }
 0x241   :  { %v1325_v10 = vpop.eup %1324 }
 0x242   :  { %v410_v11 = vmul.f32 %v1325_v10, %v405_v6  ;;  %vm415_vm3 = vweird.f32 %v1325_v10 }
 0x243   :  { %vm416_vm5 = vmor %vm414_vm4, %vm415_vm3 }
 0x244   :  { %v411_v12 = vsub.f32 1.0, %v410_v11  ;;  %v718_v11 = vpop.permute.xlu2 %717 }
 0x246   :  { %v412_v13 = vmul.f32 %v1325_v10, %v411_v12 }
 0x248   :  { %v413_v16 = vadd.f32 %v1325_v10, %v412_v13 }
 0x24a   :  { %v408_v18 = vpop.xlane.xlu1 %407  ;;  %v417_v19 = vsel %vm416_vm5, %v1325_v10, %v413_v16 }
 0x24b   :  { %1326 = vrcp.f32 %v408_v18  ;;  %v422_v20 = vsel %vm419_vm6, %v421_v17, %v417_v19  ;;  %v434_v27 = vand.u32 2147483648, %v408_v18  ;;  %v432_v29 = vand.u32 2147483647, %v408_v18 }
 0x24c   :  { %v437_v22 = vmul.f32 %v1321_v59, %v422_v20  ;;  %vm428_vm8 = vweird.f32 %v408_v18 }
 0x24d   :  { %v522_v21 = vpop.permute.xlu0 %521  ;;  %v435_v31 = vor.u32 1.1754944e-38, %v434_v27  ;;  %vm433_vm10 = vcmp.eq.f32.partialorder %v432_v29, 8.507059e+37 }
 0x24e   :  { %1236 = vmatpush.xpose.msk.msrb.mxu3 %vm331_vm1, %v522_v21  ;;  %1231 = vmatmul.msk.f32.vlgmr.msrb.gmra.mxu0 %vm390_vm2, %v437_v22  ;;  %v1840_v22 = vpack.i.bf16 %v1799_v9, %v1797_v8 }
 0x251   :  { %v1327_v23 = vpop.eup %1326 }
 0x252   :  { %v424_v25 = vmul.f32 %v1327_v23, %v408_v18  ;;  %1237 = vmatpush.xpose.msk.msrb.mxu3 %vm331_vm1, %v520_v24  ;;  %vm429_vm7 = vweird.f32 %v1327_v23  ;;  %v328_v18 = vld [vmem:[#allocation14 + $0x8] sm:$0xff] }
 0x253   :  { %vm430_vm9 = vmor %vm428_vm8, %vm429_vm7  ;;  %680 = vmatpush.msrb.mxu2 %v328_v18 }
 0x254   :  { %v425_v26 = vsub.f32 1.0, %v424_v25 }
 0x255   :  { %v518_v36 = vpop.permute.xlu0 %517 }
 0x256   :  { %v426_v28 = vmul.f32 %v1327_v23, %v425_v26  ;;  %1235 = vmatmul.msk.f32.vlgmr.msra.gmra.mxu0 %vm331_vm1, %v486_v58 }
 0x258   :  { %v427_v30 = vadd.f32 %v1327_v23, %v426_v28 }
 0x25a   :  { %v431_v32 = vsel %vm430_vm9, %v1327_v23, %v427_v30 }
 0x25b   :  { %v436_v34 = vsel %vm433_vm10, %v435_v31, %v431_v32 }
 0x25c   :  { %v438_v35 = vmul.f32 %v1323_v0, %v436_v34 }
 0x25e   :  { %1232 = vmatmul.msk.f32.vlgmr.msra.gmra.mxu3 %vm390_vm2, %v438_v35 }
 0x25f   :  { %709 = vmatpush.msra.mxu3 %v327_v45 }
 0x262   :  { %v1286_v39 = vpop.permute.xlu1 %1285 }
 0x263   :  { %v1288_v40 = vunpack.i.h.bf16 %v1286_v39  ;;  %v1287_v44 = vunpack.i.l.bf16 %v1286_v39 }
 0x265   :  { %622 = vmatpush.msrb.mxu0 %v1287_v44 }
 0x266   :  { %1238 = vmatmul.msk.f32.vlgmr.msrb.gmra.mxu3 %vm331_vm1, %v518_v36 }
 0x267   :  { %623 = vmatpush.msrb.mxu0 %v1288_v40 }
 0x2cb   :  { %v459_v46 = vpop.f32.mrf.mxu0 }
 0x2cc   :  { %1243 = vmatmul.msk.f32.vlgmr.msra.gmra.mxu3 %vm331_vm1, %v459_v46 }
 0x2d3   :  { %v514_v47 = vpop.f32.mrf.mxu0 }
 0x2d4   :  { %v549_v48 = vsel %vm390_vm2, %v514_v47, -inf }
 0x2d5   :  { %550 = vmax.xlane.f32.xlu0 %v549_v48 }
 0x2e1   :  { %v482_v49 = vpop.f32.mrf.mxu3 }
 0x2e2   :  { %1244 = vmatmul.msk.f32.gmra.mxu3 %vm331_vm1, %v482_v49 }
 0x2e9   :  { %721 = vrot.lane.b32.xlu0 %v1750_v37, %s1597_s10  ;;  %v546_v56 = vpop.f32.mrf.mxu3 }
 0x2ea   :  { %v552_v57 = vsel %vm390_vm2, %v546_v56, -inf }
 0x348   :  { %v551_v50 = vpop.xlane.xlu0 %550 }
 0x349   :  { %v555_v51 = vsub.f32 %v514_v47, %v551_v50 }
 0x34b   :  { %v557_v52 = vmul.f32 1.442695, %v555_v51 }
 0x34d   :  { %1328 = vpow2.f32 %v557_v52 }
 0x353   :  { %v1329_v53 = vpop.eup %1328 }
 0x354   :  { %v561_v54 = vsel %vm390_vm2, %v1329_v53, 0.0 }
 0x355   :  { %562 = vadd.xlane.f32.xlu0 %v561_v54 }
 0x35b   :  { %v722_v55 = vpop.permute.xlu0 %721 }
 0x35c   :  { %1245 = vmatpush.xpose.msk.msra.mxu0 %vm331_vm1, %v722_v55 }
 0x369   :  { %719 = vrot.lane.b32.xlu0 %v1756_v38, %s1597_s10 }
 0x393   :  { %553 = vmax.xlane.f32.xlu0 %v552_v57 }
 0x3a7   :  { %922 = vrot.lane.b32.xlu0 %v1750_v37, %s1598_s0 }
 0x3af   :  { %751 = vrot.lane.b32.xlu0 %v1766_v42, %s1597_s10 }
 0x3b7   :  { %749 = vrot.lane.b32.xlu0 %v1772_v43, %s1597_s10 }
 0x3c8   :  { %v563_v58 = vpop.xlane.xlu0 %562 }
 0x3c9   :  { %1330 = vrcp.f32 %v563_v58  ;;  %v578_v62 = vand.u32 2147483648, %v563_v58  ;;  %v576_v0 = vand.u32 2147483647, %v563_v58  ;;  %vm572_vm12 = vweird.f32 %v563_v58 }
 0x3cb   :  { %v579_v4 = vor.u32 1.1754944e-38, %v578_v62  ;;  %vm577_vm14 = vcmp.eq.f32.partialorder %v576_v0, 8.507059e+37 }
 0x3cf   :  { %v1331_v59 = vpop.eup %1330 }
 0x3d0   :  { %v568_v60 = vmul.f32 %v1331_v59, %v563_v58  ;;  %vm573_vm11 = vweird.f32 %v1331_v59  ;;  %v1860_v58 = vpop.f32.mrf.mxu3 }
 0x3d1   :  { %vm574_vm13 = vmor %vm572_vm12, %vm573_vm11 }
 0x3d2   :  { %v569_v61 = vsub.f32 1.0, %v568_v60 }
 0x3d4   :  { %v570_v63 = vmul.f32 %v1331_v59, %v569_v61 }
 0x3d6   :  { %v571_v1 = vadd.f32 %v1331_v59, %v570_v63 }
 0x3d8   :  { %v575_v37 = vsel %vm574_vm13, %v1331_v59, %v571_v1 }
 0x3d9   :  { %v580_v5 = vsel %vm577_vm14, %v579_v4, %v575_v37  ;;  %v1863_v37 = vpop.f32.mrf.mxu3 }
 0x3da   :  { %v595_v6 = vmul.f32 %v1329_v53, %v580_v5 }
 0x3db   :  { %v720_v10 = vpop.permute.xlu0 %719 }
 0x3dc   :  { %1239 = vmatmul.msk.f32.vlgmr.msrb.gmra.mxu0 %vm390_vm2, %v595_v6 }
 0x3dd   :  { %1246 = vmatpush.xpose.msk.msra.mxu0 %vm331_vm1, %v720_v10 }
 0x3e4   :  { %1247 = vmatmul.msk.f32.vlgmr.msra.gmra.mxu0 %vm331_vm1, %v718_v11 }
 0x406   :  { %v554_v12 = vpop.xlane.xlu0 %553 }
 0x407   :  { %v556_v13 = vsub.f32 %v546_v56, %v554_v12  ;;  %v329_v12 = vld [vmem:[#allocation14 + $0x10] sm:$0xff] }
 0x408   :  { %908 = vmatpush.msra.mxu2 %v329_v12 }
 0x409   :  { %v559_v14 = vmul.f32 1.442695, %v556_v13 }
 0x40b   :  { %1332 = vpow2.f32 %v559_v14 }
 0x411   :  { %v1333_v15 = vpop.eup %1332 }
 0x412   :  { %v564_v16 = vsel %vm390_vm2, %v1333_v15, 0.0 }
 0x413   :  { %565 = vadd.xlane.f32.xlu1 %v564_v16 }
 0x419   :  { %v923_v17 = vpop.permute.xlu0 %922 }
 0x41a   :  { %1255 = vmatpush.xpose.msk.msrb.mxu3 %vm331_vm1, %v923_v17 }
 0x421   :  { %v752_v39 = vpop.permute.xlu0 %751 }
 0x429   :  { %v750_v49 = vpop.permute.xlu0 %749 }
 0x42c   :  { %753 = vrot.lane.b32.xlu1 %v1764_v41, %s1597_s10 }
 0x434   :  { %920 = vrot.lane.b32.xlu1 %v1756_v38, %s1598_s0 }
 0x43c   :  { %954 = vrot.lane.b32.xlu1 %v1764_v41, %s1598_s0 }
 0x459   :  { %v625_v19 = vpop.f32.mrf.mxu0 }
 0x45a   :  { %1241 = vmatmul.msk.f32.vlgmr.msrb.gmra.mxu2 %vm331_vm1, %v625_v19 }
 0x461   :  { %v746_v20 = vpop.f32.mrf.mxu0 }
 0x462   :  { %v781_v21 = vsel %vm390_vm2, %v746_v20, -inf }
 0x463   :  { %782 = vmax.xlane.f32.xlu2 %v781_v21 }
 0x47b   :  { %1290 = vrot.lane.b32.xlu2 %v1840_v22, %s1596_s16 }
 0x483   :  { %1295 = vrot.lane.b32.xlu2 %v1793_v3, %s1597_s10 }
 0x486   :  { %v566_v38 = vpop.xlane.xlu1 %565 }
 0x487   :  { %1334 = vrcp.f32 %v566_v38  ;;  %v592_v29 = vand.u32 2147483648, %v566_v38  ;;  %vm586_vm3 = vweird.f32 %v566_v38 }
 0x489   :  { %v593_v31 = vor.u32 1.1754944e-38, %v592_v29 }
 0x48b   :  { %918 = vrot.lane.b32.xlu2 %v1743_v33, %s1598_s0  ;;  %v590_v33 = vand.u32 2147483647, %v566_v38 }
 0x48d   :  { %v1335_v8 = vpop.eup %1334  ;;  %vm591_vm5 = vcmp.eq.f32.partialorder %v590_v33, 8.507059e+37 }
 0x48e   :  { %v582_v9 = vmul.f32 %v1335_v8, %v566_v38  ;;  %vm587_vm15 = vweird.f32 %v1335_v8 }
 0x48f   :  { %vm588_vm4 = vmor %vm586_vm3, %vm587_vm15 }
 0x490   :  { %v583_v24 = vsub.f32 1.0, %v582_v9 }
 0x492   :  { %v584_v25 = vmul.f32 %v1335_v8, %v583_v24 }
 0x493   :  { %950 = vrot.lane.b32.xlu2 %v1772_v43, %s1598_s0 }
 0x494   :  { %v585_v28 = vadd.f32 %v1335_v8, %v584_v25 }
 0x496   :  { %v589_v43 = vsel %vm588_vm4, %v1335_v8, %v585_v28 }
 0x497   :  { %v594_v34 = vsel %vm591_vm5, %v593_v31, %v589_v43 }
 0x498   :  { %v596_v45 = vmul.f32 %v1333_v15, %v594_v34 }
 0x49e   :  { %v754_v41 = vpop.permute.xlu1 %753 }
 0x4a6   :  { %v921_v23 = vpop.permute.xlu1 %920 }
 0x4a7   :  { %1256 = vmatpush.xpose.msk.msrb.mxu3 %vm331_vm1, %v921_v23 }
 0x4ae   :  { %v955_v50 = vpop.permute.xlu1 %954 }
 0x4d6   :  { %v783_v26 = vpop.xlane.xlu2 %782 }
 0x4d7   :  { %v787_v27 = vsub.f32 %v746_v20, %v783_v26 }
 0x4d9   :  { %v789_v30 = vmul.f32 1.442695, %v787_v27 }
 0x4db   :  { %1336 = vpow2.f32 %v789_v30 }
 0x4de   :  { %v1291_v32 = vpop.permute.xlu2 %1290 }
 0x4df   :  { %v1292_v35 = vunpack.i.l.bf16 %v1291_v32  ;;  %v1293_v40 = vunpack.i.h.bf16 %v1291_v32 }
 0x4e1   :  { %v1337_v36 = vpop.eup %1336  ;;  %653 = vmatpush.msra.mxu1 %v1292_v35 }
 0x4e2   :  { %v793_v44 = vsel %vm390_vm2, %v1337_v36, 0.0 }
 0x4e3   :  { %794 = vadd.xlane.f32.xlu0 %v793_v44  ;;  %654 = vmatpush.msra.mxu1 %v1293_v40 }
 0x4e4   :  { %1240 = vmatmul.msk.f32.vlgmr.msra.gmra.mxu1 %vm390_vm2, %v596_v45 }
 0x4e5   :  { %1248 = vmatpush.xpose.msk.msrb.mxu1 %vm331_vm1, %v754_v41 }
 0x4e6   :  { %v1296_v46 = vpop.permute.xlu2 %1295 }
 0x4e7   :  { %v1297_v47 = vunpack.i.l.bf16 %v1296_v46  ;;  %v1298_v48 = vunpack.i.h.bf16 %v1296_v46 }
 0x4e9   :  { %1249 = vmatpush.xpose.msk.msrb.mxu1 %vm331_vm1, %v752_v39  ;;  %852 = vmatpush.msrb.mxu0 %v1297_v47 }
 0x4eb   :  { %853 = vmatpush.msrb.mxu0 %v1298_v48 }
 0x4ec   :  { %1250 = vmatmul.msk.f32.vlgmr.msrb.gmra.mxu1 %vm331_vm1, %v750_v49 }
 0x4ed   :  { %1258 = vmatpush.xpose.msk.msra.mxu0 %vm331_vm1, %v955_v50 }
 0x4ee   :  { %v919_v51 = vpop.permute.xlu2 %918 }
 0x4ef   :  { %1257 = vmatmul.msk.f32.vlgmr.msrb.gmra.mxu3 %vm331_vm1, %v919_v51 }
 0x4f6   :  { %v951_v6 = vpop.permute.xlu2 %950 }
 0x4f7   :  { %952 = vrot.lane.b32.xlu0 %v1766_v42, %s1598_s0 }
 0x556   :  { %v795_v52 = vpop.xlane.xlu0 %794 }
 0x557   :  { %1338 = vrcp.f32 %v795_v52  ;;  %v810_v56 = vand.u32 2147483648, %v795_v52  ;;  %v808_v60 = vand.u32 2147483647, %v795_v52  ;;  %vm804_vm7 = vweird.f32 %v795_v52 }
 0x559   :  { %v811_v62 = vor.u32 1.1754944e-38, %v810_v56  ;;  %vm809_vm9 = vcmp.eq.f32.partialorder %v808_v60, 8.507059e+37 }
 0x55d   :  { %v1339_v53 = vpop.eup %1338 }
 0x55e   :  { %v800_v54 = vmul.f32 %v1339_v53, %v795_v52  ;;  %vm805_vm6 = vweird.f32 %v1339_v53 }
 0x55f   :  { %vm806_vm8 = vmor %vm804_vm7, %vm805_vm6 }
 0x560   :  { %v801_v55 = vsub.f32 1.0, %v800_v54 }
 0x561   :  { %v656_v57 = vpop.f32.mrf.mxu1 }
 0x562   :  { %v802_v59 = vmul.f32 %v1339_v53, %v801_v55  ;;  %1242 = vmatmul.msk.f32.gmra.mxu2 %vm331_vm1, %v656_v57 }
 0x564   :  { %v803_v61 = vadd.f32 %v1339_v53, %v802_v59 }
 0x566   :  { %v807_v63 = vsel %vm806_vm8, %v1339_v53, %v803_v61 }
 0x567   :  { %v812_v42 = vsel %vm809_vm9, %v811_v62, %v807_v63  ;;  %v330_v62 = vld [vmem:[#allocation14 + $0x18] sm:$0xff] }
 0x568   :  { %v827_v0 = vmul.f32 %v1337_v36, %v812_v42 }
 0x569   :  { %v953_v1 = vpop.permute.xlu0 %952  ;;  %v778_v4 = vpop.f32.mrf.mxu1 }
 0x56a   :  { %1251 = vmatmul.msk.f32.vlgmr.msrb.gmra.mxu0 %vm390_vm2, %v827_v0  ;;  %v784_v5 = vsel %vm390_vm2, %v778_v4, -inf }
 0x56b   :  { %1259 = vmatpush.xpose.msk.msra.mxu0 %vm331_vm1, %v953_v1  ;;  %785 = vmax.xlane.f32.xlu1 %v784_v5 }
 0x56f   :  { %1109 = vmatpush.msrb.mxu0 %v330_v62  ;;  %v1318_v62 = vld [vmem:[%s1928_s12] ss:$0 sm:$0xff]  ;;  %s1600_s12 = smov [#allocation16]  }
 0x572   :  { %v947_v10 = vpop.f32.mrf.mxu3  ;;  %1260 = vmatmul.msk.f32.vlgmr.msra.gmra.mxu0 %vm331_vm1, %v951_v6 }
 0x573   :  { %v982_v11 = vsel %vm390_vm2, %v947_v10, -inf }
 0x574   :  { %983 = vmax.xlane.f32.xlu0 %v982_v11 }
 0x5de   :  { %v786_v13 = vpop.xlane.xlu1 %785 }
 0x5df   :  { %v788_v14 = vsub.f32 %v778_v4, %v786_v13 }
 0x5e1   :  { %v791_v15 = vmul.f32 1.442695, %v788_v14 }
 0x5e3   :  { %1340 = vpow2.f32 %v791_v15 }
 0x5e7   :  { %v984_v16 = vpop.xlane.xlu0 %983  ;;  %v855_v17 = vpop.f32.mrf.mxu0 }
 0x5e8   :  { %v988_v18 = vsub.f32 %v947_v10, %v984_v16  ;;  %1253 = vmatmul.msk.f32.vlgmr.msra.gmra.mxu2 %vm331_vm1, %v855_v17 }
 0x5e9   :  { %v1341_v19 = vpop.eup %1340 }
 0x5ea   :  { %v796_v20 = vsel %vm390_vm2, %v1341_v19, 0.0  ;;  %v990_v21 = vmul.f32 1.442695, %v988_v18 }
 0x5eb   :  { %797 = vadd.xlane.f32.xlu1 %v796_v20 }
 0x5ec   :  { %1342 = vpow2.f32 %v990_v21 }
 0x5ef   :  { %v979_v38 = vpop.f32.mrf.mxu0 }
 0x5f0   :  { %v985_v41 = vsel %vm390_vm2, %v979_v38, -inf }
 0x5f1   :  { %986 = vmax.xlane.f32.xlu2 %v985_v41 }
 0x5f2   :  { %v1343_v23 = vpop.eup %1342 }
 0x5f3   :  { %v994_v8 = vsel %vm390_vm2, %v1343_v23, 0.0 }
 0x5f9   :  { %995 = vadd.xlane.f32.xlu2 %v994_v8 }
 0x604   :  { %1300 = vrot.lane.b32.xlu1 %v1840_v22, %s1597_s10 }
 0x611   :  { %1305 = vrot.lane.b32.xlu2 %v1793_v3, %s1598_s0 }
 0x65e   :  { %v798_v9 = vpop.xlane.xlu1 %797 }
 0x65f   :  { %1344 = vrcp.f32 %v798_v9  ;;  %v824_v3 = vand.u32 2147483648, %v798_v9  ;;  %vm818_vm11 = vweird.f32 %v798_v9  ;;  %v822_v34 = vand.u32 2147483647, %v798_v9 }
 0x661   :  { %v825_v40 = vor.u32 1.1754944e-38, %v824_v3  ;;  %vm823_vm13 = vcmp.eq.f32.partialorder %v822_v34, 8.507059e+37 }
 0x664   :  { %v987_v24 = vpop.xlane.xlu2 %986 }
 0x665   :  { %v1345_v25 = vpop.eup %1344  ;;  %v989_v26 = vsub.f32 %v979_v38, %v987_v24  ;;  %v1317_v24 = vld [vmem:[%s1927_s11] ss:$0 sm:$0xff] }
 0x666   :  { %v814_v27 = vmul.f32 %v1345_v25, %v798_v9  ;;  %vm819_vm10 = vweird.f32 %v1345_v25 }
 0x667   :  { %v992_v28 = vmul.f32 1.442695, %v989_v26  ;;  %vm820_vm12 = vmor %vm818_vm11, %vm819_vm10 }
 0x668   :  { %v815_v29 = vsub.f32 1.0, %v814_v27 }
 0x669   :  { %1346 = vpow2.f32 %v992_v28  ;;  %v1599_v28 = vmov 32.0  }
 0x66a   :  { %v816_v30 = vmul.f32 %v1345_v25, %v815_v29 }
 0x66c   :  { %v996_v33 = vpop.xlane.xlu2 %995  ;;  %v817_v31 = vadd.f32 %v1345_v25, %v816_v30 }
 0x66d   :  { %1348 = vrcp.f32 %v996_v33  ;;  %v1011_v50 = vand.u32 2147483648, %v996_v33  ;;  %vm1005_vm15 = vweird.f32 %v996_v33  ;;  %v1009_v53 = vand.u32 2147483647, %v996_v33 }
 0x66e   :  { %v821_v36 = vsel %vm820_vm12, %v1345_v25, %v817_v31 }
 0x66f   :  { %v1878_v43 = vpop.eup %1346  ;;  %v826_v46 = vsel %vm823_vm13, %v825_v40, %v821_v36  ;;  %v1012_v57 = vor.u32 1.1754944e-38, %v1011_v50  ;;  %vm1010_vm4 = vcmp.eq.f32.partialorder %v1009_v53, 8.507059e+37 }
 0x670   :  { %v997_v32 = vsel %vm390_vm2, %v1878_v43, 0.0  ;;  %v828_v54 = vmul.f32 %v1341_v19, %v826_v46  ;;  %v682_v19 = vpop.f32.mrf.mxu2 }
 0x671   :  { %998 = vadd.xlane.f32.xlu0 %v997_v32  ;;  %v712_v38 = vadd.f32 %v1860_v58, %v682_v19 }
 0x673   :  { %v1349_v35 = vpop.eup %1348 }
 0x674   :  { %v1001_v39 = vmul.f32 %v1349_v35, %v996_v33  ;;  %vm1006_vm14 = vweird.f32 %v1349_v35  ;;  %v1306_v49 = vpop.permute.xlu2 %1305 }
 0x675   :  { %vm1007_vm3 = vmor %vm1005_vm15, %vm1006_vm14  ;;  %v1307_v55 = vunpack.i.l.bf16 %v1306_v49  ;;  %v1308_v59 = vunpack.i.h.bf16 %v1306_v49 }
 0x676   :  { %v1002_v44 = vsub.f32 1.0, %v1001_v39  ;;  %v1301_v45 = vpop.permute.xlu1 %1300 }
 0x677   :  { %v1302_v47 = vunpack.i.l.bf16 %v1301_v45  ;;  %v1303_v51 = vunpack.i.h.bf16 %v1301_v45 }
 0x678   :  { %v1003_v48 = vmul.f32 %v1349_v35, %v1002_v44  ;;  %v685_v20 = vpop.f32.mrf.mxu2 }
 0x679   :  { %881 = vmatpush.msra.mxu1 %v1302_v47  ;;  %v715_v34 = vadd.f32 %v1863_v37, %v685_v20 }
 0x67a   :  { %v1004_v52 = vadd.f32 %v1349_v35, %v1003_v48 }
 0x67b   :  { %882 = vmatpush.msra.mxu1 %v1303_v51 }
 0x67c   :  { %v1008_v56 = vsel %vm1007_vm3, %v1349_v35, %v1004_v52  ;;  %1252 = vmatmul.msk.f32.vlgmr.msra.gmra.mxu1 %vm390_vm2, %v828_v54 }
 0x67d   :  { %1053 = vmatpush.msrb.mxu1 %v1307_v55  ;;  %v1013_v60 = vsel %vm1010_vm4, %v1012_v57, %v1008_v56 }
 0x67e   :  { %v1028_v61 = vmul.f32 %v1343_v23, %v1013_v60 }
 0x67f   :  { %1054 = vmatpush.msrb.mxu1 %v1308_v59 }
 0x680   :  { %v910_v21 = vpop.f32.mrf.mxu2 }
 0x681   :  { %v916_v41 = vadd.f32 %v910_v21, %v712_v38 }
 0x684   :  { %1261 = vmatmul.msk.f32.vlgmr.msrb.gmra.mxu1 %vm390_vm2, %v1028_v61 }
 0x685   :  { %1310 = vrot.lane.b32.xlu0 %v1840_v22, %s1598_s0 }
 0x6e4   :  { %v999_v63 = vpop.xlane.xlu0 %998 }
 0x6e5   :  { %1350 = vrcp.f32 %v999_v63  ;;  %v1025_v6 = vand.u32 2147483648, %v999_v63  ;;  %vm1019_vm6 = vweird.f32 %v999_v63  ;;  %v1023_v10 = vand.u32 2147483647, %v999_v63 }
 0x6e6   :  { %1352 = vrcp.f32 %v1599_v28 }
 0x6e7   :  { %v1026_v12 = vor.u32 1.1754944e-38, %v1025_v6  ;;  %vm1024_vm8 = vcmp.eq.f32.partialorder %v1023_v10, 8.507059e+37 }
 0x6eb   :  { %v1351_v42 = vpop.eup %1350 }
 0x6ec   :  { %v1015_v0 = vmul.f32 %v1351_v42, %v999_v63  ;;  %vm1020_vm5 = vweird.f32 %v1351_v42  ;;  %v1353_v29 = vpop.eup %1352 }
 0x6ed   :  { %vm1021_vm7 = vmor %vm1019_vm6, %vm1020_vm5  ;;  %v1134_v58 = vmul.f32 32.0, %v1353_v29 }
 0x6ee   :  { %v1016_v1 = vsub.f32 1.0, %v1015_v0  ;;  %v1319_v0 = vld [vmem:[%s1929_s13] ss:$0 sm:$0xff]  ;;  %s1196_s13 = sshll.u32 %s1600_s12, 4  ;;  %s1197_s13 = int_to_ptr.vmem [resolvable:$true] %s1196_s13 }
 0x6ef   :  { %v1135_v30 = vsub.f32 1.0, %v1134_v58 }
 0x6f0   :  { %v1017_v4 = vmul.f32 %v1351_v42, %v1016_v1 }
 0x6f1   :  { %v1136_v33 = vmul.f32 %v1353_v29, %v1135_v30 }
 0x6f2   :  { %v1018_v5 = vadd.f32 %v1351_v42, %v1017_v4 }
 0x6f4   :  { %v1022_v11 = vsel %vm1021_vm7, %v1351_v42, %v1018_v5 }
 0x6f5   :  { %v1027_v14 = vsel %vm1024_vm8, %v1026_v12, %v1022_v11 }
 0x6f6   :  { %v1029_v17 = vmul.f32 %v1878_v43, %v1027_v14  ;;  %v1137_v43 = vadd.f32 %v1353_v29, %v1136_v33 }
 0x6f7   :  { %v1311_v13 = vpop.permute.xlu0 %1310 }
 0x6f8   :  { %v1312_v22 = vunpack.i.l.bf16 %v1311_v13  ;;  %v1313_v16 = vunpack.i.h.bf16 %v1311_v13 }
 0x6f9   :  { %v884_v15 = vpop.f32.mrf.mxu1 }
 0x6fa   :  { %1254 = vmatmul.msk.f32.gmra.mxu2 %vm331_vm1, %v884_v15  ;;  %1082 = vmatpush.msra.mxu3 %v1312_v22 }
 0x6fc   :  { %1083 = vmatpush.msra.mxu3 %v1313_v16 }
 0x6fd   :  { %1262 = vmatmul.msk.f32.vlgmr.msra.gmra.mxu3 %vm390_vm2, %v1029_v17  ;;  %vm1138_vm2 = vweird.f32 %v1353_v29 }
 0x6fe   :  { %v1139_v31 = vsel %vm1138_vm2, %v1353_v29, %v1137_v43 }
 0x701   :  { %v1056_v18 = vpop.f32.mrf.mxu1 }
 0x702   :  { %1263 = vmatmul.msk.f32.vlgmr.msrb.gmra.mxu0 %vm331_vm1, %v1056_v18 }
 0x77d   :  { %v913_v32 = vpop.f32.mrf.mxu2 }
 0x77e   :  { %v917_v36 = vadd.f32 %v913_v32, %v715_v34 }
 0x77f   :  { %v1111_v23 = vpop.f32.mrf.mxu0 }
 0x780   :  { %v1117_v8 = vadd.f32 %v1111_v23, %v916_v41  ;;  %v1085_v9 = vpop.f32.mrf.mxu3 }
 0x781   :  { %1264 = vmatmul.msk.f32.gmra.mxu0 %vm331_vm1, %v1085_v9 }
 0x782   :  { %v1119_v25 = vadd.f32 %v1117_v8, %v1727_v7 }
 0x784   :  { %v1125_v26 = vadd.f32 %v1317_v24, %v1119_v25 }
 0x786   :  { %v1127_v27 = vsel %vm199_vm0, %v1125_v26, 0.0 }
 0x787   :  { %1128 = vadd.xlane.f32.xlu0 %v1127_v27 }
 0x7fa   :  { %v1129_v3 = vpop.xlane.xlu0 %1128 }
 0x7fb   :  { %v1140_v35 = vmul.f32 %v1139_v31, %v1129_v3 }
 0x7fd   :  { %v1142_v7 = vsub.f32 %v1125_v26, %v1140_v35 }
 0x7fe   :  { %v1114_v39 = vpop.f32.mrf.mxu0 }
 0x7ff   :  { %v1118_v40 = vadd.f32 %v1114_v39, %v917_v36  ;;  %v1144_v44 = vmul.f32 %v1142_v7, %v1142_v7 }
 0x801   :  { %v1120_v45 = vadd.f32 %v1118_v40, %v1724_v2  ;;  %v1146_v46 = vsel %vm199_vm0, %v1144_v44, 0.0 }
 0x802   :  { %1147 = vadd.xlane.f32.xlu2 %v1146_v46 }
 0x803   :  { %v1126_v47 = vadd.f32 %v1317_v24, %v1120_v45 }
 0x805   :  { %v1130_v48 = vsel %vm199_vm0, %v1126_v47, 0.0 }
 0x806   :  { %1131 = vadd.xlane.f32.xlu1 %v1130_v48 }
 0x875   :  { %v1148_v49 = vpop.xlane.xlu2 %1147 }
 0x876   :  { %v1152_v50 = vmul.f32 %v1148_v49, %v1139_v31 }
 0x878   :  { %v1154_v51 = vadd.f32 1e-05, %v1152_v50 }
 0x879   :  { %v1132_v52 = vpop.xlane.xlu1 %1131 }
 0x87a   :  { %1354 = vrsqrt.f32 %v1154_v51  ;;  %v1141_v37 = vmul.f32 %v1139_v31, %v1132_v52  ;;  %vm1162_vm9 = vweird.f32 %v1154_v51 }
 0x87c   :  { %v1143_v53 = vsub.f32 %v1126_v47, %v1141_v37 }
 0x87e   :  { %v1145_v54 = vmul.f32 %v1143_v53, %v1143_v53 }
 0x880   :  { %v1355_v55 = vpop.eup %1354  ;;  %v1149_v56 = vsel %vm199_vm0, %v1145_v54, 0.0 }
 0x881   :  { %v1157_v57 = vmul.f32 %v1355_v55, %v1154_v51  ;;  %1150 = vadd.xlane.f32.xlu0 %v1149_v56  ;;  %vm1163_vm1 = vweird.f32 %v1355_v55 }
 0x882   :  { %vm1164_vm10 = vmor %vm1162_vm9, %vm1163_vm1 }
 0x883   :  { %v1158_v2 = vmul.f32 %v1355_v55, %v1157_v57 }
 0x885   :  { %v1159_v59 = vmul.f32 0.5, %v1158_v2 }
 0x887   :  { %v1160_v60 = vsub.f32 1.5, %v1159_v59 }
 0x889   :  { %v1161_v61 = vmul.f32 %v1355_v55, %v1160_v60 }
 0x88b   :  { %v1165_v63 = vsel %vm1164_vm10, %v1355_v55, %v1161_v61 }
 0x88c   :  { %v1176_v42 = vmul.f32 %v1165_v63, %v1142_v7 }
 0x88e   :  { %v1182_v1 = vmul.f32 %v1318_v62, %v1176_v42 }
 0x890   :  { %v1188_v4 = vadd.f32 %v1319_v0, %v1182_v1 }
 0x892   :  { %1190 = vst.msk [vmem:[#allocation16] sm:$0xff] %vm199_vm0, %v1188_v4 }
 0x8f4   :  { %v1151_v5 = vpop.xlane.xlu0 %1150 }
 0x8f5   :  { %v1153_v6 = vmul.f32 %v1151_v5, %v1139_v31 }
 0x8f7   :  { %v1155_v10 = vadd.f32 1e-05, %v1153_v6 }
 0x8f9   :  { %1356 = vrsqrt.f32 %v1155_v10  ;;  %vm1172_vm12 = vweird.f32 %v1155_v10 }
 0x8ff   :  { %v1357_v11 = vpop.eup %1356 }
 0x900   :  { %v1167_v12 = vmul.f32 %v1357_v11, %v1155_v10  ;;  %vm1173_vm11 = vweird.f32 %v1357_v11 }
 0x901   :  { %vm1174_vm13 = vmor %vm1172_vm12, %vm1173_vm11 }
 0x902   :  { %v1168_v13 = vmul.f32 %v1357_v11, %v1167_v12 }
 0x904   :  { %v1169_v14 = vmul.f32 0.5, %v1168_v13 }
 0x906   :  { %v1170_v22 = vsub.f32 1.5, %v1169_v14 }
 0x908   :  { %v1171_v15 = vmul.f32 %v1357_v11, %v1170_v22 }
 0x90a   :  { %v1175_v16 = vsel %vm1174_vm13, %v1357_v11, %v1171_v15 }
 0x90b   :  { %v1177_v17 = vmul.f32 %v1175_v16, %v1143_v53 }
 0x90d   :  { %v1183_v18 = vmul.f32 %v1318_v62, %v1177_v17 }
 0x90f   :  { %v1189_v19 = vadd.f32 %v1319_v0, %v1183_v18 }
 0x911   :  { %1191 = vst.msk [vmem:[#allocation16 + $0x8] sm:$0xff] %vm199_vm0, %v1189_v19 }
 0x912   :  { %1204 = dma.vmem_to_hbm [thread:$0]  %s1197_s13, 256, %s1199_s1, [#allocation4], %s1587_s21, %s1587_s21, %s1588_s22  }
 0x913   :  { %1584 = dma.done.wait [#allocation4], 256  }
 0x914   :  { %1585 = vsyncadd [#allocation4], 4294967040 }
 0x915   :  { %1209 = vsyncpa [#allocation3], 1 }
 0x916   :  { %1210 = vsyncpa [#allocation6], 1 }
 0x917   :  { %1211 = vsyncpa [#allocation9], 1 }
 0x918   :  { %1212 = vsyncpa [#allocation12], 1 }
 0x919   :  { %1213 = vsyncpa [#allocation15], 1 }
 0x91a   :  { %1214 = vsyncpa [#allocation4], 1 }

</bundles_post_ra>
